<compile_context>
chip_gen: v7x
topology: tpu7x:2x2x1
jax: 0.10.0
libtpu: 0.0.40
codegen_flags: <defaults>
</compile_context>

<pallas_src>
import jax
import jax.numpy as jnp
from jax.experimental import pallas as pl
from jax.experimental.pallas import tpu as pltpu


def cross_mha_kernel(img_ref, wv_ref, bv_ref, wo_ref, bo_ref, o_ref, y_ref):
    """Grid = (batch tiles, L tiles).

    img_ref:        (TB, E)     image encodings (the single K/V token per row)
    wv_ref, wo_ref: (E, E)      resident projection weights (constant index_map)
    bv_ref, bo_ref: (1, E)      f32 biases (epilogue kept in f32)
    o_ref:          (TB, TL, E) output tile
    y_ref:          (TB, E) f32 VMEM scratch holding out_proj(v_proj(img)) for
                    the current batch tile; computed once at L-tile index 0.
    """
    @pl.when(pl.program_id(1) == 0)
    def _():
        # Single-key softmax weights are identically 1, so the attention output
        # equals v for every query position: y = (img @ Wv + bv) @ Wo + bo.
        v = jnp.dot(img_ref[...], wv_ref[...],
                    preferred_element_type=jnp.float32) + bv_ref[...]      # (TB, E) f32
        y_ref[...] = jnp.dot(v.astype(wo_ref.dtype), wo_ref[...],
                             preferred_element_type=jnp.float32) + bo_ref[...]

    tb, tl, e = o_ref.shape
    # Broadcast each batch row's result over the TL query positions and store
    # the whole tile in one go (last dim = E stays lane-dense).
    o_ref[...] = jnp.broadcast_to(y_ref[...][:, None, :], (tb, tl, e)).astype(o_ref.dtype)


def cross_mha_pallas(x, img_encoding, params, num_heads, *, compute_dtype=None):
    """Pallas forward of Cross_MHA.

    `params` = (wq, bq, wk, bk, wv, bv, wo, bo), weights stored (in, out).
    `compute_dtype=jnp.bfloat16` runs the matmuls with bf16 operands / f32
    accumulation (halves weight HBM/VMEM traffic, 2x MXU rate).
    """
    B, L, E = x.shape
    assert E % num_heads == 0
    wq, bq, wk, bk, wv, bv, wo, bo = params
    # With exactly one key/value token the softmax is 1, so q_proj / k_proj
    # cannot affect the result (true of the PyTorch module as well).
    del wq, bq, wk, bk

    img2 = img_encoding.reshape(B, E)
    if compute_dtype is not None:
        img2 = img2.astype(compute_dtype)
        wv = wv.astype(compute_dtype)
        wo = wo.astype(compute_dtype)
    bv2 = bv.reshape(1, E).astype(jnp.float32)
    bo2 = bo.reshape(1, E).astype(jnp.float32)

    # Batch-row tile: largest sublane-aligned tile dividing B (falls back to the
    # full batch for small B, which satisfies the "full dim" BlockSpec rule).
    TB = B
    for cand in (256, 128, 64, 32, 16, 8):
        if B % cand == 0:
            TB = cand
            break

    # Context-length tile: largest divisor of L whose double-buffered output
    # tile stays within a conservative VMEM budget (output writeback dominates;
    # weights cost an extra 2 * E^2 * itemsize * 2 bytes — pass bf16 for E >~ 2K).
    itemsize = jnp.dtype(x.dtype).itemsize
    budget = 16 * 1024 * 1024
    TL = L
    for cand in (2048, 1024, 512, 256, 128, 64, 32, 16, 8):
        if L % cand == 0 and TB * cand * E * itemsize * 2 <= budget:
            TL = cand
            break

    grid = (B // TB, L // TL)

    return pl.pallas_call(
        cross_mha_kernel,
        out_shape=jax.ShapeDtypeStruct((B, L, E), x.dtype),
        grid_spec=pltpu.PrefetchScalarGridSpec(
            num_scalar_prefetch=0,
            grid=grid,
            in_specs=[
                pl.BlockSpec((TB, E), lambda i, j: (i, 0)),   # img rows (per batch tile)
                pl.BlockSpec((E, E), lambda i, j: (0, 0)),    # wv (resident)
                pl.BlockSpec((1, E), lambda i, j: (0, 0)),    # bv
                pl.BlockSpec((E, E), lambda i, j: (0, 0)),    # wo (resident)
                pl.BlockSpec((1, E), lambda i, j: (0, 0)),    # bo
            ],
            out_specs=pl.BlockSpec((TB, TL, E), lambda i, j: (i, j, 0)),
            scratch_shapes=[pltpu.VMEM((TB, E), jnp.float32)],
        ),
        compiler_params=pltpu.CompilerParams(
            dimension_semantics=("parallel", "arbitrary")),
    )(img2, wv, bv2, wo, bo2)


def cross_mha_reference(x, img_encoding, params, num_heads):
    """Pure-JAX replica of the full PyTorch forward (for validation)."""
    B, L, E = x.shape
    Dh = E // num_heads
    wq, bq, wk, bk, wv, bv, wo, bo = params
    q = (x @ wq + bq).reshape(B, L, num_heads, Dh).transpose(0, 2, 1, 3)
    k = (img_encoding @ wk + bk).reshape(B, 1, num_heads, Dh).transpose(0, 2, 1, 3)
    v = (img_encoding @ wv + bv).reshape(B, 1, num_heads, Dh).transpose(0, 2, 1, 3)
    attn_w = jnp.einsum('bhld,bhkd->bhlk', q, k) / (Dh ** 0.5)
    attn_w = jax.nn.softmax(attn_w, axis=-1)
    attn_o = jnp.einsum('bhlk,bhkd->bhld', attn_w, v)
    attn_o = attn_o.transpose(0, 2, 1, 3).reshape(B, L, E)
    return attn_o @ wo + bo


if __name__ == "__main__":
    B, L, E, H = 2, 8, 32, 4

    key = jax.random.PRNGKey(0)
    keys = jax.random.split(key, 10)
    x = jax.random.normal(keys[0], (B, L, E), dtype=jnp.float32)
    img = jax.random.normal(keys[1], (B, E), dtype=jnp.float32)

    # deterministic parameter init (Linear: weight stored as (in, out), bias (out,))
    scale = 1.0 / (E ** 0.5)
    wq = jax.random.uniform(keys[2], (E, E), jnp.float32, -scale, scale)
    bq = jax.random.uniform(keys[3], (E,), jnp.float32, -scale, scale)
    wk = jax.random.uniform(keys[4], (E, E), jnp.float32, -scale, scale)
    bk = jax.random.uniform(keys[5], (E,), jnp.float32, -scale, scale)
    wv = jax.random.uniform(keys[6], (E, E), jnp.float32, -scale, scale)
    bv = jax.random.uniform(keys[7], (E,), jnp.float32, -scale, scale)
    wo = jax.random.uniform(keys[8], (E, E), jnp.float32, -scale, scale)
    bo = jax.random.uniform(keys[9], (E,), jnp.float32, -scale, scale)
    params = (wq, bq, wk, bk, wv, bv, wo, bo)

    # f32 path: must match the full-attention reference tightly.
    out = jax.block_until_ready(cross_mha_pallas(x, img, params, H))
    ref = cross_mha_reference(x, img, params, H)
    assert out.shape == (B, L, E)
    assert jnp.allclose(out, ref, atol=1e-5, rtol=1e-5), "mismatch vs reference (f32)"

    # bf16-weight path (perf config for real sizes): f32 accumulation, loose tol.
    out_bf16 = jax.block_until_ready(
        cross_mha_pallas(x, img, params, H, compute_dtype=jnp.bfloat16))
    assert jnp.allclose(out_bf16, ref, atol=5e-2, rtol=5e-2), "mismatch vs reference (bf16)"

    print("KERNEL_OK")
</pallas_src>

<mosaic_0001>
module attributes {stable_mosaic.version = 11 : i64} {
  func.func @cross_mha_kernel(%arg0: i32, %arg1: i32, %arg2: memref<2x32xf32, #tpu.memory_space<vmem>>, %arg3: memref<32x32xf32, #tpu.memory_space<vmem>>, %arg4: memref<1x32xf32, #tpu.memory_space<vmem>>, %arg5: memref<32x32xf32, #tpu.memory_space<vmem>>, %arg6: memref<1x32xf32, #tpu.memory_space<vmem>>, %arg7: memref<2x8x32xf32, #tpu.memory_space<vmem>>, %arg8: memref<2x32xf32, #tpu.memory_space<vmem>>) attributes {dimension_semantics = [#tpu.dimension_semantics<parallel>, #tpu.dimension_semantics<arbitrary>], iteration_bounds = array<i64: 1, 1>, scalar_prefetch = 0 : i64, scratch_operands = 1 : i64, tpu.core_type = #tpu.core_type<tc>, window_params = [{transform_indices = @transform_0, window_bounds = array<i64: 2, 32>}, {pipeline_mode = #tpu.pipeline_mode<synchronous>, transform_indices = @transform_1, window_bounds = array<i64: 32, 32>}, {pipeline_mode = #tpu.pipeline_mode<synchronous>, transform_indices = @transform_2, window_bounds = array<i64: 1, 32>}, {pipeline_mode = #tpu.pipeline_mode<synchronous>, transform_indices = @transform_3, window_bounds = array<i64: 32, 32>}, {pipeline_mode = #tpu.pipeline_mode<synchronous>, transform_indices = @transform_4, window_bounds = array<i64: 1, 32>}, {transform_indices = @transform_5, window_bounds = array<i64: 2, 8, 32>}]} {
    %c0_i32 = arith.constant 0 : i32
    %0 = arith.cmpi eq, %arg1, %c0_i32 : i32
    %1 = arith.extui %0 : i1 to i32
    %c0_i32_0 = arith.constant 0 : i32
    %2 = arith.cmpi ne, %1, %c0_i32_0 : i32
    scf.if %2 {
      %c0_5 = arith.constant 0 : index
      %c0_6 = arith.constant 0 : index
      %8 = vector.load %arg2[%c0_5, %c0_6] : memref<2x32xf32, #tpu.memory_space<vmem>>, vector<2x32xf32>
      %c0_7 = arith.constant 0 : index
      %c0_8 = arith.constant 0 : index
      %9 = vector.load %arg3[%c0_7, %c0_8] : memref<32x32xf32, #tpu.memory_space<vmem>>, vector<32x32xf32>
      %cst = arith.constant dense<0.000000e+00> : vector<2x32xf32>
      %10 = tpu.matmul %8, %9, %cst {dimension_numbers = #tpu.dot_dimension_numbers<[1], [0], [0], [1], [0, 0, 1, 1], [], []>} : vector<2x32xf32>, vector<32x32xf32>, vector<2x32xf32> -> vector<2x32xf32>
      %c0_9 = arith.constant 0 : index
      %c0_10 = arith.constant 0 : index
      %11 = vector.load %arg4[%c0_9, %c0_10] : memref<1x32xf32, #tpu.memory_space<vmem>>, vector<1x32xf32>
      %12 = vector.broadcast %11 : vector<1x32xf32> to vector<2x32xf32>
      %13 = arith.addf %10, %12 : vector<2x32xf32>
      %c0_11 = arith.constant 0 : index
      %c0_12 = arith.constant 0 : index
      %14 = vector.load %arg5[%c0_11, %c0_12] : memref<32x32xf32, #tpu.memory_space<vmem>>, vector<32x32xf32>
      %cst_13 = arith.constant dense<0.000000e+00> : vector<2x32xf32>
      %15 = tpu.matmul %13, %14, %cst_13 {dimension_numbers = #tpu.dot_dimension_numbers<[1], [0], [0], [1], [0, 0, 1, 1], [], []>} : vector<2x32xf32>, vector<32x32xf32>, vector<2x32xf32> -> vector<2x32xf32>
      %c0_14 = arith.constant 0 : index
      %c0_15 = arith.constant 0 : index
      %16 = vector.load %arg6[%c0_14, %c0_15] : memref<1x32xf32, #tpu.memory_space<vmem>>, vector<1x32xf32>
      %17 = vector.broadcast %16 : vector<1x32xf32> to vector<2x32xf32>
      %18 = arith.addf %15, %17 : vector<2x32xf32>
      %c0_16 = arith.constant 0 : index
      %c0_17 = arith.constant 0 : index
      %19 = vector.load %arg8[%c0_16, %c0_17] : memref<2x32xf32, #tpu.memory_space<vmem>>, vector<2x32xf32>
      tpu.vector_store %arg8[%c0_16, %c0_17], %18 {strides = array<i32>} : memref<2x32xf32, #tpu.memory_space<vmem>>, vector<2x32xf32>,
    } else {
    }
    %c0 = arith.constant 0 : index
    %c0_1 = arith.constant 0 : index
    %3 = vector.load %arg8[%c0, %c0_1] : memref<2x32xf32, #tpu.memory_space<vmem>>, vector<2x32xf32>
    %4 = vector.shape_cast %3 : vector<2x32xf32> to vector<2x1x32xf32>
    %5 = vector.shape_cast %4 : vector<2x1x32xf32> to vector<2x1x32xf32>
    %6 = vector.broadcast %5 : vector<2x1x32xf32> to vector<2x8x32xf32>
    %c0_2 = arith.constant 0 : index
    %c0_3 = arith.constant 0 : index
    %c0_4 = arith.constant 0 : index
    %7 = vector.load %arg7[%c0_2, %c0_3, %c0_4] : memref<2x8x32xf32, #tpu.memory_space<vmem>>, vector<2x8x32xf32>
    tpu.vector_store %arg7[%c0_2, %c0_3, %c0_4], %6 {strides = array<i32>} : memref<2x8x32xf32, #tpu.memory_space<vmem>>, vector<2x8x32xf32>,
    return
  }
  func.func @transform_0(%arg0: i32, %arg1: i32) -> (i32, i32) {
    %c0_i32 = arith.constant 0 : i32
    %c0_i32_0 = arith.constant 0 : i32
    return %arg0, %c0_i32 : i32, i32
  }
  func.func @transform_1(%arg0: i32, %arg1: i32) -> (i32, i32) {
    %c0_i32 = arith.constant 0 : i32
    %c0_i32_0 = arith.constant 0 : i32
    %c0_i32_1 = arith.constant 0 : i32
    return %c0_i32, %c0_i32_0 : i32, i32
  }
  func.func @transform_2(%arg0: i32, %arg1: i32) -> (i32, i32) {
    %c0_i32 = arith.constant 0 : i32
    %c0_i32_0 = arith.constant 0 : i32
    %c0_i32_1 = arith.constant 0 : i32
    return %c0_i32, %c0_i32_0 : i32, i32
  }
  func.func @transform_3(%arg0: i32, %arg1: i32) -> (i32, i32) {
    %c0_i32 = arith.constant 0 : i32
    %c0_i32_0 = arith.constant 0 : i32
    %c0_i32_1 = arith.constant 0 : i32
    return %c0_i32, %c0_i32_0 : i32, i32
  }
  func.func @transform_4(%arg0: i32, %arg1: i32) -> (i32, i32) {
    %c0_i32 = arith.constant 0 : i32
    %c0_i32_0 = arith.constant 0 : i32
    %c0_i32_1 = arith.constant 0 : i32
    return %c0_i32, %c0_i32_0 : i32, i32
  }
  func.func @transform_5(%arg0: i32, %arg1: i32) -> (i32, i32, i32) {
    %c0_i32 = arith.constant 0 : i32
    %c0_i32_0 = arith.constant 0 : i32
    return %arg0, %arg1, %c0_i32 : i32, i32, i32
  }
}

</mosaic_0001>

<bundles_post_ra>
// kernel: tpu_custom_call.1
= control target key start
LH: loop header
LB: loop body
LE: loop exit
PB: predicated region body
PF: predicated region fallthrough
CT: control target
= control target key end

     0   :  { %10 = vsyncpa [#allocation4], 0  ;;  %s551_s0 = inlined_call_operand.hbm [shape: f32[2,32], index: 0, kind: input, shape index: {}]   ;;  %s552_s1 = inlined_call_operand.hbm [shape: f32[32,32], index: 1, kind: input, shape index: {}]   ;;  %s553_s2 = inlined_call_operand.vmem [shape: f32[1,32], index: 2, kind: input, shape index: {}]   ;;  %s554_s3 = inlined_call_operand.hbm [shape: f32[32,32], index: 3, kind: input, shape index: {}]   ;;  %s555_s4 = inlined_call_operand.vmem [shape: f32[1,32], index: 4, kind: input, shape index: {}]   ;;  %s556_s5 = inlined_call_operand.hbm [shape: f32[2,8,32], index: 5, kind: output, shape index: {}]  }
   0x1   :  { %11 = vsyncpa [#allocation7], 0 }
   0x2   :  { %12 = vsyncpa [#allocation5], 0  ;;  %s444_s18 = smov [#allocation6]   ;;  %s350_s22 = scalar_lea.hbm %s552_s1, 512 }
   0x3   :  { %s28_s19 = sshll.u32 %s444_s18, 4  ;;  %p351_p0 = scmp.ne.s32.totalorder %s552_s1, %s350_s22  ;;  %s29_s19 = int_to_ptr.vmem [resolvable:$true] %s28_s19 }
   0x4   :  { %p354_p1 = scmp.lt.u32.totalorder %s350_s22, %s552_s1 }
   0x6   :  { %p356_p2 = pnand %p354_p1, %p351_p0 }
   0x8   :  { %359 = shalt.err (!%p356_p2)
}
   0x9   :  { %s360_s27 = scalar_lea.vmem %s29_s19, 512  ;;  %p365_p4 = scmp.lt.s32.totalorder %s29_s19, %s29_s19 }
   0xa   :  { %p361_p3 = scmp.ne.s32.totalorder %s29_s19, %s360_s27  ;;  %p366_p5 = scmp.lt.s32.totalorder %s360_s27, %s360_s27 }
   0xc   :  { %p367_p6 = por %p366_p5, %p365_p4 }
   0xe   :  { %p368_p7 = pnand %p367_p6, %p361_p3 }
  0x10   :  { %371 = shalt.err (!%p368_p7)
}
  0x11   :  { %s445_s28 = smov 128   ;;  %s446_s29 = smov 8  }
  0x12   :  { %34 = dma.hbm_to_vmem [thread:$0]  %s552_s1, 512, %s29_s19, [#allocation7], %s445_s28, %s445_s28, %s446_s29  }
  0x13   :  { %s447_s7 = smov [#allocation3]   ;;  %s448_s9 = smov [#allocation8]  }
  0x14   :  { %s19_s8 = sshll.u32 %s447_s7, 4  ;;  %s42_s10 = sshll.u32 %s448_s9, 4  ;;  %s20_s8 = int_to_ptr.vmem [resolvable:$true] %s19_s8  ;;  %s43_s10 = int_to_ptr.vmem [resolvable:$true] %s42_s10 }
  0x15   :  { %s372_s13 = scalar_lea.hbm %s551_s0, 32 }
  0x16   :  { %p373_p8 = scmp.ne.s32.totalorder %s551_s0, %s372_s13  ;;  %p376_p9 = scmp.lt.u32.totalorder %s372_s13, %s551_s0 }
  0x18   :  { %p378_p10 = pnand %p376_p9, %p373_p8 }
  0x1a   :  { %381 = shalt.err (!%p378_p10)
}
  0x1b   :  { %s382_s1 = scalar_lea.vmem %s20_s8, 32  ;;  %p387_p12 = scmp.lt.s32.totalorder %s20_s8, %s20_s8 }
  0x1c   :  { %p383_p11 = scmp.ne.s32.totalorder %s20_s8, %s382_s1  ;;  %p388_p13 = scmp.lt.s32.totalorder %s382_s1, %s382_s1 }
  0x1e   :  { %p389_p0 = por %p388_p13, %p387_p12 }
  0x20   :  { %p390_p1 = pnand %p389_p0, %p383_p11 }
  0x22   :  { %393 = shalt.err (!%p390_p1)
}
  0x23   :  { %22 = dma.hbm_to_vmem [thread:$0]  %s551_s0, 32, %s20_s8, [#allocation4]  }
  0x24   :  { %s394_s22 = scalar_lea.hbm %s554_s3, 512 }
  0x25   :  { %p395_p2 = scmp.ne.s32.totalorder %s554_s3, %s394_s22  ;;  %p398_p3 = scmp.lt.u32.totalorder %s394_s22, %s554_s3 }
  0x27   :  { %p400_p4 = pnand %p398_p3, %p395_p2 }
  0x29   :  { %403 = shalt.err (!%p400_p4)
}
  0x2a   :  { %s404_s27 = scalar_lea.vmem %s43_s10, 512  ;;  %p409_p6 = scmp.lt.s32.totalorder %s43_s10, %s43_s10 }
  0x2b   :  { %p405_p5 = scmp.ne.s32.totalorder %s43_s10, %s404_s27  ;;  %p410_p7 = scmp.lt.s32.totalorder %s404_s27, %s404_s27 }
  0x2d   :  { %p411_p8 = por %p410_p7, %p409_p6 }
  0x2f   :  { %p412_p9 = pnand %p411_p8, %p405_p5 }
  0x31   :  { %415 = shalt.err (!%p412_p9)
}
  0x32   :  { %48 = dma.hbm_to_vmem [thread:$0]  %s554_s3, 512, %s43_s10, [#allocation7], %s445_s28, %s445_s28, %s446_s29  }
  0x33   :  { %438 = dma.done.wait [#allocation4], 32  }
  0x34   :  { %439 = vsyncadd [#allocation4], 4294967264 }
  0x35   :  { %440 = dma.done.wait [#allocation7], 1024  }
  0x36   :  { %441 = vsyncadd [#allocation7], 4294966272  ;;  %v449_v0 = vmov 0.0|0.0   ;;  %vm450_vm0 = vmmov 0   ;;  %v451_v1 = vmov 0.0   ;;  %v65_v2 = vld [vmem:[#allocation6] sm:$0xff]  ;;  %v249_v22 = vlaneseq }
  0x37   :  { %328 = vmatprep.subr.bf16.mxu0 %v449_v0  ;;  %314 = vmatprep.mubr.msk.f32.mxu0 %vm450_vm0, %v451_v1  ;;  %v66_v3 = vld [vmem:[#allocation6 + $0x8] sm:$0xff]  ;;  %v67_v4 = vld [vmem:[#allocation6 + $0x10] sm:$0xff]  ;;  %v68_v6 = vld [vmem:[#allocation6 + $0x18] sm:$0xff]  ;;  %vm76_vm1 = vcmask 261120   ;;  %v452_v20 = vmov 1966171168  }
  0x38   :  { %334 = vmatprep.subr.bf16.mxu1 %v449_v0  ;;  %325 = vmatprep.mubr.msk.f32.mxu1 %vm450_vm0, %v451_v1  ;;  %v329_v5 = vpack.c.bf16 %v66_v3, %v65_v2  ;;  %v150_v7 = vld [vmem:[#allocation8] sm:$0xff]  ;;  %v151_v8 = vld [vmem:[#allocation8 + $0x8] sm:$0xff]  ;;  %v332_v9 = vpack.c.bf16 %v68_v6, %v67_v4  ;;  %v64_v11 = vld [vmem:[#allocation3] sm:$0x3]  ;;  %v247_v21 = vunpack.c.l.s4 %v452_v20  ;;  %vm234_vm2 = vcmask 254976  }
  0x39   :  { %v335_v10 = vpack.c.bf16 %v151_v8, %v150_v7  ;;  %v152_v12 = vld [vmem:[#allocation8 + $0x10] sm:$0xff]  ;;  %v153_v13 = vld [vmem:[#allocation8 + $0x18] sm:$0xff]  ;;  %v250_v27 = vshrl.u32 %v249_v22, 7 }
  0x3a   :  { %330 = vmatpush3.bf16.msra.mxu0 %v329_v5  ;;  %v338_v14 = vpack.c.bf16 %v153_v13, %v152_v12  ;;  %v291_v15 = vld [vmem:[%s553_s2] ss:$0 sm:$0xff]  ;;  %v248_v26 = vunpack.c.0.s8 %v247_v21  ;;  %s453_s2 = smov [#allocation9]  }
  0x3b   :  { %331 = vmatprep.subr.bf16.mxu0 %v449_v0  ;;  %336 = vmatpush3.bf16.msra.mxu1 %v335_v10  ;;  %v293_v19 = vld [vmem:[%s555_s4] ss:$0 sm:$0xff]  ;;  %v262_v29 = vsub.s32 0, %v250_v27  ;;  %s278_s9 = sshll.u32 %s453_s2, 4  ;;  %s279_s9 = int_to_ptr.vmem [resolvable:$true] %s278_s9 }
  0x3c   :  { %337 = vmatprep.subr.bf16.mxu1 %v449_v0  ;;  %v251_v28 = vsub.s32 %v248_v26, %v250_v27  ;;  %s416_s4 = scalar_lea.vmem %s279_s9, 256  ;;  %p421_p11 = scmp.lt.s32.totalorder %s279_s9, %s279_s9 }
  0x3d   :  { %p417_p10 = scmp.ne.s32.totalorder %s279_s9, %s416_s4  ;;  %p422_p12 = scmp.lt.s32.totalorder %s416_s4, %s416_s4 }
  0x3e   :  { %333 = vmatpush3.bf16.msra.mxu0 %v332_v9 }
  0x3f   :  { %339 = vmatpush3.bf16.msra.mxu1 %v338_v14  ;;  %p423_p13 = por %p422_p12, %p421_p11 }
  0x41   :  { %315 = vmatmul.mubr.msk.f32.vlgmr.msra.gmra.mrb[0].mxu0 %vm76_vm1, %v64_v11  ;;  %p424_p0 = pnand %p423_p13, %p417_p10 }
 0x114   :  { %v146_v16 = vpop.f32.mrb[0].mxu0 }
 0x115   :  { %v147_v17 = vadd.f32 %v291_v15, %v146_v16  ;;  %v316_v18 = vpop.f32.mrb[1].mxu0 }
 0x117   :  { %326 = vmatmul.mubr.msk.f32.vlgmr.msra.gmra.mrb[0].mxu1 %vm76_vm1, %v147_v17 }
 0x1ea   :  { %v230_v23 = vpop.f32.mrb[0].mxu1 }
 0x1eb   :  { %v231_v24 = vadd.f32 %v293_v19, %v230_v23  ;;  %v327_v25 = vpop.f32.mrb[1].mxu1 }
 0x1ed   :  { %235 = vst.msk [vmem:[#allocation2] sm:$0x3] %vm234_vm2, %v231_v24 }
 0x1f4   :  { %v295_v30 = vld.sshfl [vmem:[#allocation2] sm:$0x11 pattern:$0x75316420] }
 0x1f5   :  { %v245_v31 = vcombine.high %v295_v30, %v295_v30  ;;  %v252_v32 = vrot.slane %v295_v30, %v251_v28 }
 0x1f7   :  { %v259_v33 = vrot.slane %v245_v31, %v251_v28  ;;  %v263_v34 = vrot.slane %v252_v32, %v262_v29 }
 0x1f9   :  { %v267_v35 = vrot.slane %v259_v33, %v262_v29  ;;  %271 = vst.msk [vmem:[#allocation9] sm:$0xff] %vm76_vm1, %v263_v34 }
 0x1fb   :  { %272 = vst.msk [vmem:[#allocation9 + $0x8] sm:$0xff] %vm76_vm1, %v267_v35 }
 0x1fc   :  { %427 = shalt.err (!%p424_p0)
}
 0x1fd   :  { %s428_s12 = scalar_lea.hbm %s556_s5, 256 }
 0x1fe   :  { %p429_p1 = scmp.ne.s32.totalorder %s556_s5, %s428_s12  ;;  %p432_p2 = scmp.lt.u32.totalorder %s428_s12, %s556_s5 }
 0x200   :  { %p434_p3 = pnand %p432_p2, %p429_p1 }
 0x202   :  { %437 = shalt.err (!%p434_p3)
}
 0x203   :  { %284 = dma.vmem_to_hbm [thread:$0]  %s279_s9, 256, %s556_s5, [#allocation5], %s445_s28, %s445_s28, %s446_s29  }
 0x204   :  { %442 = dma.done.wait [#allocation5], 256  }
 0x205   :  { %443 = vsyncadd [#allocation5], 4294967040 }
 0x206   :  { %288 = vsyncpa [#allocation4], 1 }
 0x207   :  { %289 = vsyncpa [#allocation7], 1 }
 0x208   :  { %290 = vsyncpa [#allocation5], 1 }

</bundles_post_ra>
